<compile_context>
chip_gen: v7x
topology: tpu7x:2x2x1
jax: 0.10.0
libtpu: 0.0.40
codegen_flags: <defaults>
</compile_context>

<pallas_src>
from functools import partial

import jax
import jax.numpy as jnp
from jax.experimental import pallas as pl
from jax.experimental.pallas import tpu as pltpu


def _round_up(x, m):
    return (x + m - 1) // m * m


# ----------------------------------------------------------------------------
# TABlock: fused q/k/v projection + attention + softmax + (attn @ v)^T.
# Processes `bb` batch items per grid step; their q/k/v projections are folded
# into a single matmul for MXU M-occupancy, attention stays per-batch-item.
# The output block is the TRANSPOSED (N, C) result so the caller's scrambling
# reshape is zero-copy.
# ----------------------------------------------------------------------------
def _tablock_kernel(x_ref, wqkv_ref, bqkv_ref, o_ref, *, bb, C, N, Npad, norm):
    xb = x_ref[...].astype(jnp.bfloat16)                               # (bb*C, N)
    qkv = jnp.dot(xb, wqkv_ref[...], preferred_element_type=jnp.float32)
    qkv = qkv + bqkv_ref[...]                                          # (bb*C, 3*Npad)
    q = qkv[:, 0:N]                                                    # 128-aligned
    k = qkv[:, Npad:Npad + N]
    v = qkv[:, 2 * Npad:2 * Npad + N]
    for i in range(bb):                                                # static unroll
        lo = i * C
        q_i = q[lo:lo + C].astype(jnp.bfloat16)
        k_i = k[lo:lo + C].astype(jnp.bfloat16)
        v_i = v[lo:lo + C].astype(jnp.bfloat16)
        # q @ k^T as a dot_general contracting the last dims (no transpose op).
        s = jax.lax.dot_general(q_i, k_i, (((1,), (1,)), ((), ())),
                                preferred_element_type=jnp.float32) * norm  # (C, C)
        s = s - jnp.max(s, axis=-1, keepdims=True)
        e = jnp.exp(s)
        p = e * pl.reciprocal(jnp.sum(e, axis=-1, keepdims=True), approx=True)
        # av_t[n, c] = sum_j v[j, n] * p[c, j]  ==  ((attn @ v))^T, emitted
        # pre-transposed so the XLA-side transpose disappears.
        av_t = jax.lax.dot_general(v_i, p.astype(jnp.bfloat16),
                                   (((0,), (1,)), ((), ())),
                                   preferred_element_type=jnp.float32)      # (N, C)
        o_ref[i] = av_t.astype(o_ref.dtype)


def _pick_block_b(B, C, max_rows=1024):
    """Largest batch fold with bb*C <= max_rows, keeping >= 2 grid steps
    (v7x megacore) when B allows."""
    cands = [bb for bb in (16, 8, 4, 2, 1) if B % bb == 0 and bb * C <= max_rows]
    if not cands:
        return 1
    for bb in cands:                       # descending -> largest bb with grid >= 2
        if B // bb >= 2:
            return bb
    return cands[0]


def tablock(x, p):
    """x: (B, C, N) -> (B, C, N), reproducing TABlock.forward (eval mode)."""
    B, C, N = x.shape
    Npad = p["wqkv_t"].shape[1] // 3       # static
    bb = _pick_block_b(B, C)
    x2 = x.reshape(B * C, N)               # leading-dim collapse, free in XLA
    kernel = partial(_tablock_kernel, bb=bb, C=C, N=N, Npad=Npad,
                     norm=float(N) ** (-0.5))
    out_t = pl.pallas_call(
        kernel,
        out_shape=jax.ShapeDtypeStruct((B, N, C), x.dtype),
        grid=(B // bb,),
        in_specs=[
            pl.BlockSpec((bb * C, N), lambda b: (b, 0)),
            pl.BlockSpec((N, 3 * Npad), lambda b: (0, 0)),
            pl.BlockSpec((1, 3 * Npad), lambda b: (0, 0)),
        ],
        out_specs=pl.BlockSpec((bb, N, C), lambda b: (b, 0, 0)),
        compiler_params=pltpu.CompilerParams(
            dimension_semantics=("parallel",),
            vmem_limit_bytes=48 * 1024 * 1024),
    )(x2, p["wqkv_t"], p["bqkv"])
    # PyTorch: x = (attn @ v).transpose(1, 2).reshape(B, C, N); proj_drop = id;
    # + residual.  The kernel already produced the transposed (B, N, C) layout,
    # so this reshape is a zero-copy reinterpretation; only the residual add
    # remains as one fused XLA pass.
    return out_t.reshape(B, C, N) + x


# ----------------------------------------------------------------------------
# 1x1 Conv2d on NCHW == per-batch channel matmul on (Cin, H*W), full-HW tile.
# ----------------------------------------------------------------------------
def _conv1x1_kernel(x_ref, w_ref, b_ref, o_ref):
    x = x_ref[0].astype(jnp.bfloat16)                                  # (Cin, HW)
    y = jnp.dot(w_ref[...], x, preferred_element_type=jnp.float32) + b_ref[...]
    o_ref[0] = y.astype(o_ref.dtype)


def conv1x1(x, w, b):
    """x: (B, Cin, H*W) channel-major -> (B, Cout, H*W)."""
    B, Cin, HW = x.shape
    Cout = w.shape[0]
    return pl.pallas_call(
        _conv1x1_kernel,
        out_shape=jax.ShapeDtypeStruct((B, Cout, HW), x.dtype),
        grid=(B,),
        in_specs=[
            pl.BlockSpec((1, Cin, HW), lambda i: (i, 0, 0)),
            pl.BlockSpec((Cout, Cin), lambda i: (0, 0)),
            pl.BlockSpec((Cout, 1), lambda i: (0, 0)),
        ],
        out_specs=pl.BlockSpec((1, Cout, HW), lambda i: (i, 0, 0)),
        compiler_params=pltpu.CompilerParams(
            dimension_semantics=("parallel",),
            vmem_limit_bytes=48 * 1024 * 1024),
    )(x, w, b)


# ----------------------------------------------------------------------------
# Fused conv2 (1x1) + fc_score / fc_weight head, channel-major: all contractions
# are (out, in) @ (in, HW) so HW stays on the lane axis.  fc_score/fc_weight
# first layers are stacked into one (2d, d) matmul, second layers merged into a
# single block-diagonal (2, 2d) matmul.  Several batch items per grid step.
# ----------------------------------------------------------------------------
def _conv2_head_kernel(x_ref, wc_ref, bc_ref, w1_ref, b1_ref, w2_ref, b2_ref,
                       o_ref, *, bb, d):
    for i in range(bb):                                                # static unroll
        x = x_ref[i].astype(jnp.bfloat16)                              # (E, N)
        xc = jnp.dot(wc_ref[...], x, preferred_element_type=jnp.float32) + bc_ref[...]
        hg = jnp.maximum(
            jnp.dot(w1_ref[...], xc.astype(jnp.bfloat16),
                    preferred_element_type=jnp.float32) + b1_ref[...], 0.0)  # (2d, N)
        fw = jnp.dot(w2_ref[...], hg.astype(jnp.bfloat16),
                     preferred_element_type=jnp.float32) + b2_ref[...]       # (2, N)
        f = jnp.maximum(fw[0:1], 0.0)                                  # fc_score: ReLU
        w = jax.nn.sigmoid(fw[1:2])                                    # fc_weight: Sigmoid
        num = jnp.sum(f * w, axis=-1, keepdims=True)                   # (1, 1)
        den = jnp.sum(w, axis=-1, keepdims=True)
        o_ref[i] = (num / den).astype(o_ref.dtype)                     # exact division


def _pick_head_bb(B, cap=16):
    for bb in range(min(B, cap), 0, -1):
        if B % bb == 0:
            return bb
    return 1


def conv2_score_head(x, params):
    """x: (B, E, N) channel-major -> (B,) weighted quality scores."""
    B, E, N = x.shape
    p = params["head"]
    wc, bc = params["conv2_w"], params["conv2_b"]
    d = wc.shape[0]
    bb = _pick_head_bb(B)
    kernel = partial(_conv2_head_kernel, bb=bb, d=d)
    out = pl.pallas_call(
        kernel,
        out_shape=jax.ShapeDtypeStruct((B, 1, 1), x.dtype),
        grid=(B // bb,),
        in_specs=[
            pl.BlockSpec((bb, E, N), lambda b: (b, 0, 0)),
            pl.BlockSpec((d, E), lambda b: (0, 0)),
            pl.BlockSpec((d, 1), lambda b: (0, 0)),
            pl.BlockSpec((2 * d, d), lambda b: (0, 0)),
            pl.BlockSpec((2 * d, 1), lambda b: (0, 0)),
            pl.BlockSpec((2, 2 * d), lambda b: (0, 0)),
            pl.BlockSpec((2, 1), lambda b: (0, 0)),
        ],
        out_specs=pl.BlockSpec((bb, 1, 1), lambda b: (b, 0, 0)),
        compiler_params=pltpu.CompilerParams(
            dimension_semantics=("parallel",)),
    )(x, wc, bc, p["w1"], p["b1"], p["w2"], p["b2"])
    return out.reshape(B)


# ----------------------------------------------------------------------------
# Parameters (deterministic, synthetic).  Stored kernel-ready: matmul weights
# pre-transposed / packed and cast to bf16, biases f32 in broadcast shape.
# ----------------------------------------------------------------------------
def _linear_init(key, out_f, in_f):
    kw, kb = jax.random.split(key)
    w = jax.random.normal(kw, (out_f, in_f), jnp.float32) * (in_f ** -0.5)
    b = jax.random.normal(kb, (out_f,), jnp.float32) * 0.01
    return w, b


def init_params(key, embed_dim, input_size, num_tab=2):
    N = input_size * input_size
    Npad = _round_up(N, 128)
    d = embed_dim // 2
    keys = list(jax.random.split(key, 6 * num_tab + 6))
    ki = iter(keys)

    def tab_params():
        wq, bq = _linear_init(next(ki), N, N)
        wk, bk = _linear_init(next(ki), N, N)
        wv, bv = _linear_init(next(ki), N, N)
        # Pack pre-transposed q|k|v into one (N, 3*Npad) weight; each slab is
        # zero-padded to a 128-lane boundary so the q/k/v result slices stay
        # lane-aligned (padded columns compute exact zeros and are sliced off).
        wqkv = jnp.zeros((N, 3 * Npad), jnp.float32)
        bqkv = jnp.zeros((1, 3 * Npad), jnp.float32)
        for s, (w, b) in enumerate(((wq, bq), (wk, bk), (wv, bv))):
            wqkv = wqkv.at[:, s * Npad:s * Npad + N].set(w.T)
            bqkv = bqkv.at[:, s * Npad:s * Npad + N].set(b.reshape(1, N))
        return dict(wqkv_t=wqkv.astype(jnp.bfloat16), bqkv=bqkv)

    params = {
        "tab1": [tab_params() for _ in range(num_tab)],
        "tab2": [tab_params() for _ in range(num_tab)],
    }
    w1, b1 = _linear_init(next(ki), embed_dim, 4 * embed_dim)
    params["conv1_w"] = w1.astype(jnp.bfloat16)
    params["conv1_b"] = b1.reshape(embed_dim, 1)
    w2, b2 = _linear_init(next(ki), d, embed_dim)
    params["conv2_w"] = w2.astype(jnp.bfloat16)
    params["conv2_b"] = b2.reshape(d, 1)
    ws1, bs1 = _linear_init(next(ki), d, d)
    ws2, bs2 = _linear_init(next(ki), 1, d)
    ww1, bw1 = _linear_init(next(ki), d, d)
    ww2, bw2 = _linear_init(next(ki), 1, d)
    # fc_score / fc_weight first layers stacked; second layers block-diagonal so
    # the two M=1 matmuls become a single M=2 MXU pass.
    w1s = jnp.concatenate([ws1, ww1], axis=0)                  # (2d, d)
    b1s = jnp.concatenate([bs1, bw1], axis=0).reshape(2 * d, 1)
    w2b = jnp.zeros((2, 2 * d), jnp.float32)
    w2b = w2b.at[0, :d].set(ws2[0]).at[1, d:].set(ww2[0])      # block-diagonal
    b2s = jnp.stack([bs2[0], bw2[0]]).reshape(2, 1)
    params["head"] = dict(
        w1=w1s.astype(jnp.bfloat16), b1=b1s,
        w2=w2b.astype(jnp.bfloat16), b2=b2s)
    return params


# ----------------------------------------------------------------------------
# MANIQA forward (post-feature-extraction path)
# ----------------------------------------------------------------------------
def maniqa_forward(feat, params, *, embed_dim, input_size):
    # feat: (B, input_size**2, 4*embed_dim) == extract_feature(save_output)
    x = jnp.transpose(feat, (0, 2, 1))                       # (B, 4E, N)
    for p in params["tab1"]:
        x = tablock(x, p)
    x = conv1x1(x, params["conv1_w"], params["conv1_b"])     # (B, E, N)
    # TODO(synk): swintransformer1 (not among provided dependent classes) -> identity.
    for p in params["tab2"]:
        x = tablock(x, p)
    # TODO(synk): swintransformer2 -> identity; conv2 + fc_score/fc_weight head
    # fused into one channel-major kernel below.
    return conv2_score_head(x, params)                       # (B,)


if __name__ == "__main__":
    key = jax.random.PRNGKey(0)
    B = 2
    embed_dim = 8          # small stand-in for 72
    input_size = 4         # small stand-in for 224 // 8 = 28
    N = input_size * input_size

    k_feat, k_param = jax.random.split(key)
    feat = jax.random.normal(k_feat, (B, N, 4 * embed_dim), jnp.float32)
    params = init_params(k_param, embed_dim, input_size)

    fwd = jax.jit(partial(maniqa_forward, embed_dim=embed_dim, input_size=input_size))
    score = jax.block_until_ready(fwd(feat, params))
    assert score.shape == (B,)
    assert bool(jnp.all(jnp.isfinite(score)))
    print("KERNEL_OK")
</pallas_src>

<mosaic_0001>
module attributes {stable_mosaic.version = 11 : i64} {
  func.func @_tablock_kernel(%arg0: i32, %arg1: memref<32x16xf32, #tpu.memory_space<vmem>>, %arg2: memref<16x384xbf16, #tpu.memory_space<vmem>>, %arg3: memref<1x384xf32, #tpu.memory_space<vmem>>, %arg4: memref<1x16x32xf32, #tpu.memory_space<vmem>>) attributes {dimension_semantics = [#tpu.dimension_semantics<parallel>], iteration_bounds = array<i64: 2>, scalar_prefetch = 0 : i64, scratch_operands = 0 : i64, tpu.core_type = #tpu.core_type<tc>, window_params = [{transform_indices = @transform_0, window_bounds = array<i64: 32, 16>}, {pipeline_mode = #tpu.pipeline_mode<synchronous>, transform_indices = @transform_1, window_bounds = array<i64: 16, 384>}, {pipeline_mode = #tpu.pipeline_mode<synchronous>, transform_indices = @transform_2, window_bounds = array<i64: 1, 384>}, {transform_indices = @transform_3, window_bounds = array<i64: 1, 16, 32>}]} {
    %c0 = arith.constant 0 : index
    %c0_0 = arith.constant 0 : index
    %0 = vector.load %arg1[%c0, %c0_0] : memref<32x16xf32, #tpu.memory_space<vmem>>, vector<32x16xf32>
    %1 = arith.truncf %0 : vector<32x16xf32> to vector<32x16xbf16>
    %c0_1 = arith.constant 0 : index
    %c0_2 = arith.constant 0 : index
    %2 = vector.load %arg2[%c0_1, %c0_2] : memref<16x384xbf16, #tpu.memory_space<vmem>>, vector<16x384xbf16>
    %cst = arith.constant dense<0.000000e+00> : vector<32x384xf32>
    %3 = tpu.matmul %1, %2, %cst {dimension_numbers = #tpu.dot_dimension_numbers<[1], [0], [0], [1], [0, 0, 1, 1], [], []>} : vector<32x16xbf16>, vector<16x384xbf16>, vector<32x384xf32> -> vector<32x384xf32>
    %c0_3 = arith.constant 0 : index
    %c0_4 = arith.constant 0 : index
    %4 = vector.load %arg3[%c0_3, %c0_4] : memref<1x384xf32, #tpu.memory_space<vmem>>, vector<1x384xf32>
    %5 = vector.broadcast %4 : vector<1x384xf32> to vector<32x384xf32>
    %6 = arith.addf %3, %5 : vector<32x384xf32>
    %7 = vector.extract_strided_slice %6 {offsets = [0, 0], sizes = [32, 16], strides = [1, 1]} : vector<32x384xf32> to vector<32x16xf32>
    %8 = vector.extract_strided_slice %6 {offsets = [0, 128], sizes = [32, 16], strides = [1, 1]} : vector<32x384xf32> to vector<32x16xf32>
    %9 = vector.extract_strided_slice %6 {offsets = [0, 256], sizes = [32, 16], strides = [1, 1]} : vector<32x384xf32> to vector<32x16xf32>
    %10 = arith.truncf %7 : vector<32x16xf32> to vector<32x16xbf16>
    %11 = arith.truncf %8 : vector<32x16xf32> to vector<32x16xbf16>
    %12 = arith.truncf %9 : vector<32x16xf32> to vector<32x16xbf16>
    %cst_5 = arith.constant dense<0.000000e+00> : vector<32x32xf32>
    %13 = tpu.matmul %10, %11, %cst_5 {dimension_numbers = #tpu.dot_dimension_numbers<[1], [1], [0], [0], [0, 0, 1, 0], [], []>} : vector<32x16xbf16>, vector<32x16xbf16>, vector<32x32xf32> -> vector<32x32xf32>
    %cst_6 = arith.constant 2.500000e-01 : f32
    %14 = vector.broadcast %cst_6 : f32 to vector<32x32xf32>
    %15 = arith.mulf %13, %14 : vector<32x32xf32>
    %cst_7 = arith.constant dense<0xFF800000> : vector<32xf32>
    %16 = vector.multi_reduction <maximumf>, %15, %cst_7 [1] : vector<32x32xf32> to vector<32xf32>
    %17 = vector.shape_cast %16 : vector<32xf32> to vector<32x1xf32>
    %18 = vector.broadcast %17 : vector<32x1xf32> to vector<32x32xf32>
    %19 = arith.subf %15, %18 : vector<32x32xf32>
    %20 = math.exp %19 : vector<32x32xf32>
    %cst_8 = arith.constant dense<0.000000e+00> : vector<32xf32>
    %21 = vector.multi_reduction <add>, %20, %cst_8 [1] : vector<32x32xf32> to vector<32xf32>
    %22 = vector.shape_cast %21 : vector<32xf32> to vector<32x1xf32>
    %23 = tpu.reciprocal %22 {approx = true} : vector<32x1xf32> -> vector<32x1xf32>
    %24 = vector.broadcast %23 : vector<32x1xf32> to vector<32x32xf32>
    %25 = arith.mulf %20, %24 : vector<32x32xf32>
    %26 = arith.truncf %25 : vector<32x32xf32> to vector<32x32xbf16>
    %cst_9 = arith.constant dense<0.000000e+00> : vector<16x32xf32>
    %27 = tpu.matmul %12, %26, %cst_9 {dimension_numbers = #tpu.dot_dimension_numbers<[0], [1], [1], [0], [0, 1, 1, 0], [], []>} : vector<32x16xbf16>, vector<32x32xbf16>, vector<16x32xf32> -> vector<16x32xf32>
    %c0_10 = arith.constant 0 : index
    %c0_11 = arith.constant 0 : index
    %c0_12 = arith.constant 0 : index
    %28 = vector.load %arg4[%c0_10, %c0_11, %c0_12] : memref<1x16x32xf32, #tpu.memory_space<vmem>>, vector<1x16x32xf32>
    %29 = vector.shape_cast %28 : vector<1x16x32xf32> to vector<16x32xf32>
    %30 = vector.shape_cast %27 : vector<16x32xf32> to vector<1x16x32xf32>
    tpu.vector_store %arg4[%c0_10, %c0_11, %c0_12], %30 {strides = array<i32>} : memref<1x16x32xf32, #tpu.memory_space<vmem>>, vector<1x16x32xf32>,
    return
  }
  func.func @transform_0(%arg0: i32) -> (i32, i32) {
    %c0_i32 = arith.constant 0 : i32
    %c0_i32_0 = arith.constant 0 : i32
    return %arg0, %c0_i32 : i32, i32
  }
  func.func @transform_1(%arg0: i32) -> (i32, i32) {
    %c0_i32 = arith.constant 0 : i32
    %c0_i32_0 = arith.constant 0 : i32
    %c0_i32_1 = arith.constant 0 : i32
    return %c0_i32, %c0_i32_0 : i32, i32
  }
  func.func @transform_2(%arg0: i32) -> (i32, i32) {
    %c0_i32 = arith.constant 0 : i32
    %c0_i32_0 = arith.constant 0 : i32
    %c0_i32_1 = arith.constant 0 : i32
    return %c0_i32, %c0_i32_0 : i32, i32
  }
  func.func @transform_3(%arg0: i32) -> (i32, i32, i32) {
    %c0_i32 = arith.constant 0 : i32
    %c0_i32_0 = arith.constant 0 : i32
    %c0_i32_1 = arith.constant 0 : i32
    return %arg0, %c0_i32, %c0_i32_0 : i32, i32, i32
  }
}

module attributes {stable_mosaic.version = 11 : i64} {
  func.func @_conv1x1_kernel(%arg0: i32, %arg1: memref<1x32x16xf32, #tpu.memory_space<vmem>>, %arg2: memref<8x32xbf16, #tpu.memory_space<vmem>>, %arg3: memref<8x1xf32, #tpu.memory_space<vmem>>, %arg4: memref<1x8x16xf32, #tpu.memory_space<vmem>>) attributes {dimension_semantics = [#tpu.dimension_semantics<parallel>], iteration_bounds = array<i64: 2>, scalar_prefetch = 0 : i64, scratch_operands = 0 : i64, tpu.core_type = #tpu.core_type<tc>, window_params = [{transform_indices = @transform_0, window_bounds = array<i64: 1, 32, 16>}, {pipeline_mode = #tpu.pipeline_mode<synchronous>, transform_indices = @transform_1, window_bounds = array<i64: 8, 32>}, {pipeline_mode = #tpu.pipeline_mode<synchronous>, transform_indices = @transform_2, window_bounds = array<i64: 8, 1>}, {transform_indices = @transform_3, window_bounds = array<i64: 1, 8, 16>}]} {
    %c0 = arith.constant 0 : index
    %c0_0 = arith.constant 0 : index
    %c0_1 = arith.constant 0 : index
    %0 = vector.load %arg1[%c0, %c0_0, %c0_1] : memref<1x32x16xf32, #tpu.memory_space<vmem>>, vector<1x32x16xf32>
    %1 = vector.shape_cast %0 : vector<1x32x16xf32> to vector<32x16xf32>
    %2 = arith.truncf %1 : vector<32x16xf32> to vector<32x16xbf16>
    %c0_2 = arith.constant 0 : index
    %c0_3 = arith.constant 0 : index
    %3 = vector.load %arg2[%c0_2, %c0_3] : memref<8x32xbf16, #tpu.memory_space<vmem>>, vector<8x32xbf16>
    %cst = arith.constant dense<0.000000e+00> : vector<8x16xf32>
    %4 = tpu.matmul %3, %2, %cst {dimension_numbers = #tpu.dot_dimension_numbers<[1], [0], [0], [1], [0, 0, 1, 1], [], []>} : vector<8x32xbf16>, vector<32x16xbf16>, vector<8x16xf32> -> vector<8x16xf32>
    %c0_4 = arith.constant 0 : index
    %c0_5 = arith.constant 0 : index
    %5 = vector.load %arg3[%c0_4, %c0_5] : memref<8x1xf32, #tpu.memory_space<vmem>>, vector<8x1xf32>
    %6 = vector.broadcast %5 : vector<8x1xf32> to vector<8x16xf32>
    %7 = arith.addf %4, %6 : vector<8x16xf32>
    %c0_6 = arith.constant 0 : index
    %c0_7 = arith.constant 0 : index
    %c0_8 = arith.constant 0 : index
    %8 = vector.load %arg4[%c0_6, %c0_7, %c0_8] : memref<1x8x16xf32, #tpu.memory_space<vmem>>, vector<1x8x16xf32>
    %9 = vector.shape_cast %8 : vector<1x8x16xf32> to vector<8x16xf32>
    %10 = vector.shape_cast %7 : vector<8x16xf32> to vector<1x8x16xf32>
    tpu.vector_store %arg4[%c0_6, %c0_7, %c0_8], %10 {strides = array<i32>} : memref<1x8x16xf32, #tpu.memory_space<vmem>>, vector<1x8x16xf32>,
    return
  }
  func.func @transform_0(%arg0: i32) -> (i32, i32, i32) {
    %c0_i32 = arith.constant 0 : i32
    %c0_i32_0 = arith.constant 0 : i32
    %c0_i32_1 = arith.constant 0 : i32
    return %arg0, %c0_i32, %c0_i32_0 : i32, i32, i32
  }
  func.func @transform_1(%arg0: i32) -> (i32, i32) {
    %c0_i32 = arith.constant 0 : i32
    %c0_i32_0 = arith.constant 0 : i32
    %c0_i32_1 = arith.constant 0 : i32
    return %c0_i32, %c0_i32_0 : i32, i32
  }
  func.func @transform_2(%arg0: i32) -> (i32, i32) {
    %c0_i32 = arith.constant 0 : i32
    %c0_i32_0 = arith.constant 0 : i32
    %c0_i32_1 = arith.constant 0 : i32
    return %c0_i32, %c0_i32_0 : i32, i32
  }
  func.func @transform_3(%arg0: i32) -> (i32, i32, i32) {
    %c0_i32 = arith.constant 0 : i32
    %c0_i32_0 = arith.constant 0 : i32
    %c0_i32_1 = arith.constant 0 : i32
    return %arg0, %c0_i32, %c0_i32_0 : i32, i32, i32
  }
}

module attributes {stable_mosaic.version = 11 : i64} {
  func.func @_tablock_kernel(%arg0: i32, %arg1: memref<8x16xf32, #tpu.memory_space<vmem>>, %arg2: memref<16x384xbf16, #tpu.memory_space<vmem>>, %arg3: memref<1x384xf32, #tpu.memory_space<vmem>>, %arg4: memref<1x16x8xf32, #tpu.memory_space<vmem>>) attributes {dimension_semantics = [#tpu.dimension_semantics<parallel>], iteration_bounds = array<i64: 2>, scalar_prefetch = 0 : i64, scratch_operands = 0 : i64, tpu.core_type = #tpu.core_type<tc>, window_params = [{transform_indices = @transform_0, window_bounds = array<i64: 8, 16>}, {pipeline_mode = #tpu.pipeline_mode<synchronous>, transform_indices = @transform_1, window_bounds = array<i64: 16, 384>}, {pipeline_mode = #tpu.pipeline_mode<synchronous>, transform_indices = @transform_2, window_bounds = array<i64: 1, 384>}, {transform_indices = @transform_3, window_bounds = array<i64: 1, 16, 8>}]} {
    %c0 = arith.constant 0 : index
    %c0_0 = arith.constant 0 : index
    %0 = vector.load %arg1[%c0, %c0_0] : memref<8x16xf32, #tpu.memory_space<vmem>>, vector<8x16xf32>
    %1 = arith.truncf %0 : vector<8x16xf32> to vector<8x16xbf16>
    %c0_1 = arith.constant 0 : index
    %c0_2 = arith.constant 0 : index
    %2 = vector.load %arg2[%c0_1, %c0_2] : memref<16x384xbf16, #tpu.memory_space<vmem>>, vector<16x384xbf16>
    %cst = arith.constant dense<0.000000e+00> : vector<8x384xf32>
    %3 = tpu.matmul %1, %2, %cst {dimension_numbers = #tpu.dot_dimension_numbers<[1], [0], [0], [1], [0, 0, 1, 1], [], []>} : vector<8x16xbf16>, vector<16x384xbf16>, vector<8x384xf32> -> vector<8x384xf32>
    %c0_3 = arith.constant 0 : index
    %c0_4 = arith.constant 0 : index
    %4 = vector.load %arg3[%c0_3, %c0_4] : memref<1x384xf32, #tpu.memory_space<vmem>>, vector<1x384xf32>
    %5 = vector.broadcast %4 : vector<1x384xf32> to vector<8x384xf32>
    %6 = arith.addf %3, %5 : vector<8x384xf32>
    %7 = vector.extract_strided_slice %6 {offsets = [0, 0], sizes = [8, 16], strides = [1, 1]} : vector<8x384xf32> to vector<8x16xf32>
    %8 = vector.extract_strided_slice %6 {offsets = [0, 128], sizes = [8, 16], strides = [1, 1]} : vector<8x384xf32> to vector<8x16xf32>
    %9 = vector.extract_strided_slice %6 {offsets = [0, 256], sizes = [8, 16], strides = [1, 1]} : vector<8x384xf32> to vector<8x16xf32>
    %10 = arith.truncf %7 : vector<8x16xf32> to vector<8x16xbf16>
    %11 = arith.truncf %8 : vector<8x16xf32> to vector<8x16xbf16>
    %12 = arith.truncf %9 : vector<8x16xf32> to vector<8x16xbf16>
    %cst_5 = arith.constant dense<0.000000e+00> : vector<8x8xf32>
    %13 = tpu.matmul %10, %11, %cst_5 {dimension_numbers = #tpu.dot_dimension_numbers<[1], [1], [0], [0], [0, 0, 1, 0], [], []>} : vector<8x16xbf16>, vector<8x16xbf16>, vector<8x8xf32> -> vector<8x8xf32>
    %cst_6 = arith.constant 2.500000e-01 : f32
    %14 = vector.broadcast %cst_6 : f32 to vector<8x8xf32>
    %15 = arith.mulf %13, %14 : vector<8x8xf32>
    %cst_7 = arith.constant dense<0xFF800000> : vector<8xf32>
    %16 = vector.multi_reduction <maximumf>, %15, %cst_7 [1] : vector<8x8xf32> to vector<8xf32>
    %17 = vector.shape_cast %16 : vector<8xf32> to vector<8x1xf32>
    %18 = vector.broadcast %17 : vector<8x1xf32> to vector<8x8xf32>
    %19 = arith.subf %15, %18 : vector<8x8xf32>
    %20 = math.exp %19 : vector<8x8xf32>
    %cst_8 = arith.constant dense<0.000000e+00> : vector<8xf32>
    %21 = vector.multi_reduction <add>, %20, %cst_8 [1] : vector<8x8xf32> to vector<8xf32>
    %22 = vector.shape_cast %21 : vector<8xf32> to vector<8x1xf32>
    %23 = tpu.reciprocal %22 {approx = true} : vector<8x1xf32> -> vector<8x1xf32>
    %24 = vector.broadcast %23 : vector<8x1xf32> to vector<8x8xf32>
    %25 = arith.mulf %20, %24 : vector<8x8xf32>
    %26 = arith.truncf %25 : vector<8x8xf32> to vector<8x8xbf16>
    %cst_9 = arith.constant dense<0.000000e+00> : vector<16x8xf32>
    %27 = tpu.matmul %12, %26, %cst_9 {dimension_numbers = #tpu.dot_dimension_numbers<[0], [1], [1], [0], [0, 1, 1, 0], [], []>} : vector<8x16xbf16>, vector<8x8xbf16>, vector<16x8xf32> -> vector<16x8xf32>
    %c0_10 = arith.constant 0 : index
    %c0_11 = arith.constant 0 : index
    %c0_12 = arith.constant 0 : index
    %28 = vector.load %arg4[%c0_10, %c0_11, %c0_12] : memref<1x16x8xf32, #tpu.memory_space<vmem>>, vector<1x16x8xf32>
    %29 = vector.shape_cast %28 : vector<1x16x8xf32> to vector<16x8xf32>
    %30 = vector.shape_cast %27 : vector<16x8xf32> to vector<1x16x8xf32>
    tpu.vector_store %arg4[%c0_10, %c0_11, %c0_12], %30 {strides = array<i32>} : memref<1x16x8xf32, #tpu.memory_space<vmem>>, vector<1x16x8xf32>,
    return
  }
  func.func @transform_0(%arg0: i32) -> (i32, i32) {
    %c0_i32 = arith.constant 0 : i32
    %c0_i32_0 = arith.constant 0 : i32
    return %arg0, %c0_i32 : i32, i32
  }
  func.func @transform_1(%arg0: i32) -> (i32, i32) {
    %c0_i32 = arith.constant 0 : i32
    %c0_i32_0 = arith.constant 0 : i32
    %c0_i32_1 = arith.constant 0 : i32
    return %c0_i32, %c0_i32_0 : i32, i32
  }
  func.func @transform_2(%arg0: i32) -> (i32, i32) {
    %c0_i32 = arith.constant 0 : i32
    %c0_i32_0 = arith.constant 0 : i32
    %c0_i32_1 = arith.constant 0 : i32
    return %c0_i32, %c0_i32_0 : i32, i32
  }
  func.func @transform_3(%arg0: i32) -> (i32, i32, i32) {
    %c0_i32 = arith.constant 0 : i32
    %c0_i32_0 = arith.constant 0 : i32
    %c0_i32_1 = arith.constant 0 : i32
    return %arg0, %c0_i32, %c0_i32_0 : i32, i32, i32
  }
}

module attributes {stable_mosaic.version = 11 : i64} {
  func.func @_conv2_head_kernel(%arg0: i32, %arg1: memref<2x8x16xf32, #tpu.memory_space<vmem>>, %arg2: memref<4x8xbf16, #tpu.memory_space<vmem>>, %arg3: memref<4x1xf32, #tpu.memory_space<vmem>>, %arg4: memref<8x4xbf16, #tpu.memory_space<vmem>>, %arg5: memref<8x1xf32, #tpu.memory_space<vmem>>, %arg6: memref<2x8xbf16, #tpu.memory_space<vmem>>, %arg7: memref<2x1xf32, #tpu.memory_space<vmem>>, %arg8: memref<2x1x1xf32, #tpu.memory_space<vmem>>) attributes {dimension_semantics = [#tpu.dimension_semantics<parallel>], iteration_bounds = array<i64: 1>, scalar_prefetch = 0 : i64, scratch_operands = 0 : i64, tpu.core_type = #tpu.core_type<tc>, window_params = [{transform_indices = @transform_0, window_bounds = array<i64: 2, 8, 16>}, {pipeline_mode = #tpu.pipeline_mode<synchronous>, transform_indices = @transform_1, window_bounds = array<i64: 4, 8>}, {pipeline_mode = #tpu.pipeline_mode<synchronous>, transform_indices = @transform_2, window_bounds = array<i64: 4, 1>}, {pipeline_mode = #tpu.pipeline_mode<synchronous>, transform_indices = @transform_3, window_bounds = array<i64: 8, 4>}, {pipeline_mode = #tpu.pipeline_mode<synchronous>, transform_indices = @transform_4, window_bounds = array<i64: 8, 1>}, {pipeline_mode = #tpu.pipeline_mode<synchronous>, transform_indices = @transform_5, window_bounds = array<i64: 2, 8>}, {pipeline_mode = #tpu.pipeline_mode<synchronous>, transform_indices = @transform_6, window_bounds = array<i64: 2, 1>}, {transform_indices = @transform_7, window_bounds = array<i64: 2, 1, 1>}]} {
    %c0 = arith.constant 0 : index
    %c0_0 = arith.constant 0 : index
    %c0_1 = arith.constant 0 : index
    %0 = vector.load %arg1[%c0, %c0_0, %c0_1] : memref<2x8x16xf32, #tpu.memory_space<vmem>>, vector<1x8x16xf32>
    %1 = vector.shape_cast %0 : vector<1x8x16xf32> to vector<8x16xf32>
    %2 = arith.truncf %1 : vector<8x16xf32> to vector<8x16xbf16>
    %c0_2 = arith.constant 0 : index
    %c0_3 = arith.constant 0 : index
    %3 = vector.load %arg2[%c0_2, %c0_3] : memref<4x8xbf16, #tpu.memory_space<vmem>>, vector<4x8xbf16>
    %cst = arith.constant dense<0.000000e+00> : vector<4x16xf32>
    %4 = tpu.matmul %3, %2, %cst {dimension_numbers = #tpu.dot_dimension_numbers<[1], [0], [0], [1], [0, 0, 1, 1], [], []>} : vector<4x8xbf16>, vector<8x16xbf16>, vector<4x16xf32> -> vector<4x16xf32>
    %c0_4 = arith.constant 0 : index
    %c0_5 = arith.constant 0 : index
    %5 = vector.load %arg3[%c0_4, %c0_5] : memref<4x1xf32, #tpu.memory_space<vmem>>, vector<4x1xf32>
    %6 = vector.broadcast %5 : vector<4x1xf32> to vector<4x16xf32>
    %7 = arith.addf %4, %6 : vector<4x16xf32>
    %c0_6 = arith.constant 0 : index
    %c0_7 = arith.constant 0 : index
    %8 = vector.load %arg4[%c0_6, %c0_7] : memref<8x4xbf16, #tpu.memory_space<vmem>>, vector<8x4xbf16>
    %9 = arith.truncf %7 : vector<4x16xf32> to vector<4x16xbf16>
    %cst_8 = arith.constant dense<0.000000e+00> : vector<8x16xf32>
    %10 = tpu.matmul %8, %9, %cst_8 {dimension_numbers = #tpu.dot_dimension_numbers<[1], [0], [0], [1], [0, 0, 1, 1], [], []>} : vector<8x4xbf16>, vector<4x16xbf16>, vector<8x16xf32> -> vector<8x16xf32>
    %c0_9 = arith.constant 0 : index
    %c0_10 = arith.constant 0 : index
    %11 = vector.load %arg5[%c0_9, %c0_10] : memref<8x1xf32, #tpu.memory_space<vmem>>, vector<8x1xf32>
    %12 = vector.broadcast %11 : vector<8x1xf32> to vector<8x16xf32>
    %13 = arith.addf %10, %12 : vector<8x16xf32>
    %cst_11 = arith.constant 0.000000e+00 : f32
    %14 = vector.broadcast %cst_11 : f32 to vector<8x16xf32>
    %15 = arith.maximumf %13, %14 : vector<8x16xf32>
    %c0_12 = arith.constant 0 : index
    %c0_13 = arith.constant 0 : index
    %16 = vector.load %arg6[%c0_12, %c0_13] : memref<2x8xbf16, #tpu.memory_space<vmem>>, vector<2x8xbf16>
    %17 = arith.truncf %15 : vector<8x16xf32> to vector<8x16xbf16>
    %cst_14 = arith.constant dense<0.000000e+00> : vector<2x16xf32>
    %18 = tpu.matmul %16, %17, %cst_14 {dimension_numbers = #tpu.dot_dimension_numbers<[1], [0], [0], [1], [0, 0, 1, 1], [], []>} : vector<2x8xbf16>, vector<8x16xbf16>, vector<2x16xf32> -> vector<2x16xf32>
    %c0_15 = arith.constant 0 : index
    %c0_16 = arith.constant 0 : index
    %19 = vector.load %arg7[%c0_15, %c0_16] : memref<2x1xf32, #tpu.memory_space<vmem>>, vector<2x1xf32>
    %20 = vector.broadcast %19 : vector<2x1xf32> to vector<2x16xf32>
    %21 = arith.addf %18, %20 : vector<2x16xf32>
    %22 = vector.extract_strided_slice %21 {offsets = [0, 0], sizes = [1, 16], strides = [1, 1]} : vector<2x16xf32> to vector<1x16xf32>
    %cst_17 = arith.constant 0.000000e+00 : f32
    %23 = vector.broadcast %cst_17 : f32 to vector<1x16xf32>
    %24 = arith.maximumf %22, %23 : vector<1x16xf32>
    %25 = vector.extract_strided_slice %21 {offsets = [1, 0], sizes = [1, 16], strides = [1, 1]} : vector<2x16xf32> to vector<1x16xf32>
    %26 = arith.negf %25 : vector<1x16xf32>
    %27 = math.exp %26 : vector<1x16xf32>
    %cst_18 = arith.constant 1.000000e+00 : f32
    %28 = vector.broadcast %cst_18 : f32 to vector<1x16xf32>
    %29 = arith.addf %28, %27 : vector<1x16xf32>
    %30 = arith.divf %28, %29 : vector<1x16xf32>
    %31 = arith.mulf %24, %30 : vector<1x16xf32>
    %cst_19 = arith.constant dense<0.000000e+00> : vector<1xf32>
    %32 = vector.multi_reduction <add>, %31, %cst_19 [1] : vector<1x16xf32> to vector<1xf32>
    %33 = vector.shape_cast %32 : vector<1xf32> to vector<1x1xf32>
    %cst_20 = arith.constant dense<0.000000e+00> : vector<1xf32>
    %34 = vector.multi_reduction <add>, %30, %cst_20 [1] : vector<1x16xf32> to vector<1xf32>
    %35 = vector.shape_cast %34 : vector<1xf32> to vector<1x1xf32>
    %36 = arith.divf %33, %35 : vector<1x1xf32>
    %c0_21 = arith.constant 0 : index
    %c0_22 = arith.constant 0 : index
    %c0_23 = arith.constant 0 : index
    %37 = vector.load %arg8[%c0_21, %c0_22, %c0_23] : memref<2x1x1xf32, #tpu.memory_space<vmem>>, vector<1x1x1xf32>
    %38 = vector.shape_cast %37 : vector<1x1x1xf32> to vector<1x1xf32>
    %39 = vector.shape_cast %36 : vector<1x1xf32> to vector<1x1x1xf32>
    tpu.vector_store %arg8[%c0_21, %c0_22, %c0_23], %39 {strides = array<i32>} : memref<2x1x1xf32, #tpu.memory_space<vmem>>, vector<1x1x1xf32>,
    %c1 = arith.constant 1 : index
    %c0_24 = arith.constant 0 : index
    %c0_25 = arith.constant 0 : index
    %40 = vector.load %arg1[%c1, %c0_24, %c0_25] : memref<2x8x16xf32, #tpu.memory_space<vmem>>, vector<1x8x16xf32>
    %41 = vector.shape_cast %40 : vector<1x8x16xf32> to vector<8x16xf32>
    %42 = arith.truncf %41 : vector<8x16xf32> to vector<8x16xbf16>
    %c0_26 = arith.constant 0 : index
    %c0_27 = arith.constant 0 : index
    %43 = vector.load %arg2[%c0_26, %c0_27] : memref<4x8xbf16, #tpu.memory_space<vmem>>, vector<4x8xbf16>
    %cst_28 = arith.constant dense<0.000000e+00> : vector<4x16xf32>
    %44 = tpu.matmul %43, %42, %cst_28 {dimension_numbers = #tpu.dot_dimension_numbers<[1], [0], [0], [1], [0, 0, 1, 1], [], []>} : vector<4x8xbf16>, vector<8x16xbf16>, vector<4x16xf32> -> vector<4x16xf32>
    %c0_29 = arith.constant 0 : index
    %c0_30 = arith.constant 0 : index
    %45 = vector.load %arg3[%c0_29, %c0_30] : memref<4x1xf32, #tpu.memory_space<vmem>>, vector<4x1xf32>
    %46 = vector.broadcast %45 : vector<4x1xf32> to vector<4x16xf32>
    %47 = arith.addf %44, %46 : vector<4x16xf32>
    %c0_31 = arith.constant 0 : index
    %c0_32 = arith.constant 0 : index
    %48 = vector.load %arg4[%c0_31, %c0_32] : memref<8x4xbf16, #tpu.memory_space<vmem>>, vector<8x4xbf16>
    %49 = arith.truncf %47 : vector<4x16xf32> to vector<4x16xbf16>
    %cst_33 = arith.constant dense<0.000000e+00> : vector<8x16xf32>
    %50 = tpu.matmul %48, %49, %cst_33 {dimension_numbers = #tpu.dot_dimension_numbers<[1], [0], [0], [1], [0, 0, 1, 1], [], []>} : vector<8x4xbf16>, vector<4x16xbf16>, vector<8x16xf32> -> vector<8x16xf32>
    %c0_34 = arith.constant 0 : index
    %c0_35 = arith.constant 0 : index
    %51 = vector.load %arg5[%c0_34, %c0_35] : memref<8x1xf32, #tpu.memory_space<vmem>>, vector<8x1xf32>
    %52 = vector.broadcast %51 : vector<8x1xf32> to vector<8x16xf32>
    %53 = arith.addf %50, %52 : vector<8x16xf32>
    %cst_36 = arith.constant 0.000000e+00 : f32
    %54 = vector.broadcast %cst_36 : f32 to vector<8x16xf32>
    %55 = arith.maximumf %53, %54 : vector<8x16xf32>
    %c0_37 = arith.constant 0 : index
    %c0_38 = arith.constant 0 : index
    %56 = vector.load %arg6[%c0_37, %c0_38] : memref<2x8xbf16, #tpu.memory_space<vmem>>, vector<2x8xbf16>
    %57 = arith.truncf %55 : vector<8x16xf32> to vector<8x16xbf16>
    %cst_39 = arith.constant dense<0.000000e+00> : vector<2x16xf32>
    %58 = tpu.matmul %56, %57, %cst_39 {dimension_numbers = #tpu.dot_dimension_numbers<[1], [0], [0], [1], [0, 0, 1, 1], [], []>} : vector<2x8xbf16>, vector<8x16xbf16>, vector<2x16xf32> -> vector<2x16xf32>
    %c0_40 = arith.constant 0 : index
    %c0_41 = arith.constant 0 : index
    %59 = vector.load %arg7[%c0_40, %c0_41] : memref<2x1xf32, #tpu.memory_space<vmem>>, vector<2x1xf32>
    %60 = vector.broadcast %59 : vector<2x1xf32> to vector<2x16xf32>
    %61 = arith.addf %58, %60 : vector<2x16xf32>
    %62 = vector.extract_strided_slice %61 {offsets = [0, 0], sizes = [1, 16], strides = [1, 1]} : vector<2x16xf32> to vector<1x16xf32>
    %cst_42 = arith.constant 0.000000e+00 : f32
    %63 = vector.broadcast %cst_42 : f32 to vector<1x16xf32>
    %64 = arith.maximumf %62, %63 : vector<1x16xf32>
    %65 = vector.extract_strided_slice %61 {offsets = [1, 0], sizes = [1, 16], strides = [1, 1]} : vector<2x16xf32> to vector<1x16xf32>
    %66 = arith.negf %65 : vector<1x16xf32>
    %67 = math.exp %66 : vector<1x16xf32>
    %cst_43 = arith.constant 1.000000e+00 : f32
    %68 = vector.broadcast %cst_43 : f32 to vector<1x16xf32>
    %69 = arith.addf %68, %67 : vector<1x16xf32>
    %70 = arith.divf %68, %69 : vector<1x16xf32>
    %71 = arith.mulf %64, %70 : vector<1x16xf32>
    %cst_44 = arith.constant dense<0.000000e+00> : vector<1xf32>
    %72 = vector.multi_reduction <add>, %71, %cst_44 [1] : vector<1x16xf32> to vector<1xf32>
    %73 = vector.shape_cast %72 : vector<1xf32> to vector<1x1xf32>
    %cst_45 = arith.constant dense<0.000000e+00> : vector<1xf32>
    %74 = vector.multi_reduction <add>, %70, %cst_45 [1] : vector<1x16xf32> to vector<1xf32>
    %75 = vector.shape_cast %74 : vector<1xf32> to vector<1x1xf32>
    %76 = arith.divf %73, %75 : vector<1x1xf32>
    %c1_46 = arith.constant 1 : index
    %c0_47 = arith.constant 0 : index
    %c0_48 = arith.constant 0 : index
    %77 = vector.load %arg8[%c1_46, %c0_47, %c0_48] : memref<2x1x1xf32, #tpu.memory_space<vmem>>, vector<1x1x1xf32>
    %78 = vector.shape_cast %77 : vector<1x1x1xf32> to vector<1x1xf32>
    %79 = vector.shape_cast %76 : vector<1x1xf32> to vector<1x1x1xf32>
    tpu.vector_store %arg8[%c1_46, %c0_47, %c0_48], %79 {strides = array<i32>} : memref<2x1x1xf32, #tpu.memory_space<vmem>>, vector<1x1x1xf32>,
    return
  }
  func.func @transform_0(%arg0: i32) -> (i32, i32, i32) {
    %c0_i32 = arith.constant 0 : i32
    %c0_i32_0 = arith.constant 0 : i32
    %c0_i32_1 = arith.constant 0 : i32
    return %arg0, %c0_i32, %c0_i32_0 : i32, i32, i32
  }
  func.func @transform_1(%arg0: i32) -> (i32, i32) {
    %c0_i32 = arith.constant 0 : i32
    %c0_i32_0 = arith.constant 0 : i32
    %c0_i32_1 = arith.constant 0 : i32
    return %c0_i32, %c0_i32_0 : i32, i32
  }
  func.func @transform_2(%arg0: i32) -> (i32, i32) {
    %c0_i32 = arith.constant 0 : i32
    %c0_i32_0 = arith.constant 0 : i32
    %c0_i32_1 = arith.constant 0 : i32
    return %c0_i32, %c0_i32_0 : i32, i32
  }
  func.func @transform_3(%arg0: i32) -> (i32, i32) {
    %c0_i32 = arith.constant 0 : i32
    %c0_i32_0 = arith.constant 0 : i32
    %c0_i32_1 = arith.constant 0 : i32
    return %c0_i32, %c0_i32_0 : i32, i32
  }
  func.func @transform_4(%arg0: i32) -> (i32, i32) {
    %c0_i32 = arith.constant 0 : i32
    %c0_i32_0 = arith.constant 0 : i32
    %c0_i32_1 = arith.constant 0 : i32
    return %c0_i32, %c0_i32_0 : i32, i32
  }
  func.func @transform_5(%arg0: i32) -> (i32, i32) {
    %c0_i32 = arith.constant 0 : i32
    %c0_i32_0 = arith.constant 0 : i32
    %c0_i32_1 = arith.constant 0 : i32
    return %c0_i32, %c0_i32_0 : i32, i32
  }
  func.func @transform_6(%arg0: i32) -> (i32, i32) {
    %c0_i32 = arith.constant 0 : i32
    %c0_i32_0 = arith.constant 0 : i32
    %c0_i32_1 = arith.constant 0 : i32
    return %c0_i32, %c0_i32_0 : i32, i32
  }
  func.func @transform_7(%arg0: i32) -> (i32, i32, i32) {
    %c0_i32 = arith.constant 0 : i32
    %c0_i32_0 = arith.constant 0 : i32
    %c0_i32_1 = arith.constant 0 : i32
    return %arg0, %c0_i32, %c0_i32_0 : i32, i32, i32
  }
}

</mosaic_0001>

<bundles_post_ra>
// kernel: maniqa_forward.8
= control target key start
LH: loop header
LB: loop body
LE: loop exit
PB: predicated region body
PF: predicated region fallthrough
CT: control target
= control target key end

     0   :  { %s348_s12 = smov 0   ;;  %s371_s0 = inlined_call_operand.vmem [shape: f32[2,32,16], index: 0, kind: input, shape index: {}]   ;;  %s372_s1 = inlined_call_operand.vmem [shape: bf16[8,32], index: 1, kind: input, shape index: {}]   ;;  %s373_s2 = inlined_call_operand.vmem [shape: f32[8,1], index: 2, kind: input, shape index: {}]   ;;  %s374_s3 = inlined_call_operand.vmem [shape: f32[2,8,16], index: 3, kind: output, shape index: {}]  }
   0x1 LB: > { %s282_s13 = sadd.s32 4294967295, %s323_s12   ;;  %p286_p0 = scmp.ge.s32.totalorder %s323_s12, 1  ;;  %s323_s12 = sphi %s348_s12, %s13_s12  }
   0x2   : > { %p137_p1 = scmp.lt.s32.totalorder %s323_s12, 3 }
   0x4   : > { %p138_p2 = pnand %p286_p0, %p137_p1 }
   0x5   : > { %p160_p3 = scmp.lt.s32.totalorder (!%p138_p2), %s282_s13, 1  ;;  %v325_v0 = vmov (!%p138_p2), 0.0   ;;  %vm326_vm0 = vmmov (!%p138_p2), 0   ;;  %v177_v1 = vld [vmem:[%s373_s2] sm:$0xff] (!%p138_p2)  ;;  %v327_v2 = vmov (!%p138_p2), 0   ;;  %vm183_vm1 = vcmask (!%p138_p2), 261120  }
   0x6   : > { %141 = sbr.rel (%p138_p2) target bundleno = 241 (0xf1), region = 32  ;;  %297 = vmatprep.subr.bf16.mxu0 (!%p138_p2), %v325_v0  ;;  %301 = vmatprep.mubr.msk.bf16.mxu0 (!%p138_p2), %vm326_vm0, %v325_v0  ;;  %v176_v9 = vld [vmem:[%s372_s1] sm:$0xf] (!%p138_p2)  ;;  %vm227_vm2 = vcmask (!%p138_p2), 130048  }
   0x7   : > { %316 = vset.pattern.permute.xlu0 (!%p138_p2), %v327_v2 }
   0x8   : > { %180 = vperm.xlu0 (!%p138_p2), %316, %v177_v1  }
   0xd   : > { %s376_s13 = smov (!%p160_p3, %s282_s13), 1 }
   0xe   : > { %s293_s16 = sshll.u32 %s376_s13, 5  ;;  %s289_s22 = sshll.u32 %s376_s13, 3 }
   0xf   : > { %s164_s19 = scalar_lea.vmem %s371_s0, %s293_s16  ;;  %s168_s25 = scalar_lea.vmem %s374_s3, %s289_s22 }
  0x10   : > { %v170_v3 = vld [vmem:[%s164_s19] sm:$0xff]  ;;  %v171_v4 = vld [vmem:[%s164_s19 + $0x8] sm:$0xff]  ;;  %v172_v5 = vld [vmem:[%s164_s19 + $0x10] sm:$0xff] }
  0x11   : > { %v174_v6 = vpack.c.bf16 %v171_v4, %v170_v3  ;;  %v173_v7 = vld [vmem:[%s164_s19 + $0x18] sm:$0xff] }
  0x12   : > { %v175_v8 = vpack.c.bf16 %v173_v7, %v172_v5 }
  0x13   : > { %298 = vmatpush3.bf16.msra.mxu0 %v174_v6 }
  0x14   : > { %299 = vmatprep.subr.bf16.mxu0 %v325_v0 }
  0x17   : > { %300 = vmatpush3.bf16.msra.mxu0 %v175_v8 }
  0x1a   : > { %302 = vmatmul.mubr.msk.bf16.vlgmr.msra.gmra.mrb[0].mxu0 %vm183_vm1, %v176_v9 }
  0x87   : > { %v181_v10 = vpop.permute.xlu0 %180 }
  0xed   : > { %v221_v11 = vpop.f32.mrb[0].mxu0 }
  0xee   : > { %v222_v12 = vadd.f32 %v221_v11, %v181_v10  ;;  %v303_v13 = vpop.f32.mrb[1].mxu0 }
  0xef   : > { %v224_v14 = vpop.f32.mrb[2].mxu0 }
  0xf0   : > { %228 = vst.msk [vmem:[%s168_s25] sm:$0xff] %vm227_vm2, %v222_v12  ;;  %v304_v15 = vpop.f32.mrb[3].mxu0 }
  0xf1 PF: > { %s13_s12 = sadd.s32 1, %s323_s12  }
  0xf2   : > { %p10_p4 = scmp.ge.s32.totalorder %s13_s12, 4  }
  0xf4   :  { %12 = sbr.rel (!%p10_p4) target bundleno = 1 (0x1), region = 62 }

// kernel: maniqa_forward.6
= control target key start
LH: loop header
LB: loop body
LE: loop exit
PB: predicated region body
PF: predicated region fallthrough
CT: control target
= control target key end

     0   :  { %s685_s12 = smov 0   ;;  %s742_s0 = inlined_call_operand.vmem [shape: f32[64,16], index: 0, kind: input, shape index: {}]   ;;  %s743_s1 = inlined_call_operand.vmem [shape: bf16[16,384], index: 1, kind: input, shape index: {}]   ;;  %s744_s2 = inlined_call_operand.vmem [shape: f32[1,384], index: 2, kind: input, shape index: {}]   ;;  %s745_s3 = inlined_call_operand.vmem [shape: f32[2,16,32], index: 3, kind: output, shape index: {}]  }
   0x1 LB: > { %s691_s13 = sadd.s32 4294967295, %s660_s12   ;;  %p571_p0 = scmp.ge.s32.totalorder %s660_s12, 1  ;;  %s660_s12 = sphi %s685_s12, %s13_s12  }
   0x2   : > { %p138_p1 = scmp.lt.s32.totalorder %s660_s12, 3 }
   0x4   : > { %p139_p2 = pnand %p571_p0, %p138_p1 }
   0x5   : > { %v634_v0 = vld [vmem:[%s743_s1 + $0x4] ss:$12 sps:$4 sm:$0xff] (!%p139_p2)   ;;  %s572_s16 = sshll.u32 (!%p139_p2), %s691_s13, 2  ;;  %v636_v1 = vld [vmem:[%s743_s1] ss:$12 sps:$4 sm:$0xff] (!%p139_p2)   ;;  %v662_v2 = vmov (!%p139_p2), 0   ;;  %v186_v9 = vlaneseq (!%p139_p2) }
   0x6   : > { %142 = sbr.rel (%p139_p2) target bundleno = 1020 (0x3fc), region = 32  ;;  %256 = vmatprep.mubr.bf16.mxu0 (!%p139_p2), %v662_v2  ;;  %p163_p3 = scmp.lt.s32.totalorder (!%p139_p2), %s572_s16, 7  ;;  %224 = vmatprep.subr.bf16.mxu0 (!%p139_p2), %v634_v0  ;;  %vm217_vm0 = vcmask (!%p139_p2), 130048   ;;  %v184_v12 = vld [vmem:[%s744_s2] sm:$0x7] (!%p139_p2)  ;;  %vm397_vm1 = vcmask (!%p139_p2), 261120  }
   0x7   : > { %225 = vmatpush1.bf16.msra.mxu0 (!%p139_p2), %v636_v1  ;;  %v187_v10 = vshrl.u32 (!%p139_p2), %v186_v9, 7  ;;  %v637_v38 = vld [vmem:[%s743_s1 + $0x8] ss:$12 sps:$4 sm:$0xff] (!%p139_p2)   ;;  %vm664_vm2 = vmmov (!%p139_p2), 0   ;;  %p168_p4 = scmp.lt.s32.totalorder (!%p139_p2), %s691_s13, 1 }
   0x8   : > { %599 = vmatprep.subr.bf16.mxu1 (!%p139_p2), %v637_v38 }
   0x9   : > { %v188_v11 = vsub.s32 (!%p139_p2), 0, %v187_v10  ;;  %v192_v13 = vsub.s32 (!%p139_p2), 1, %v187_v10  ;;  %600 = vmatpush3.bf16.msra.mxu1 (!%p139_p2), %v637_v38  ;;  %v196_v51 = vsub.s32 (!%p139_p2), 2, %v187_v10 }
   0xb   : > { %v189_v14 = vrot.slane (!%p139_p2), %v184_v12, %v188_v11  ;;  %v193_v16 = vrot.slane (!%p139_p2), %v184_v12, %v192_v13  ;;  %v197_v52 = vrot.slane (!%p139_p2), %v184_v12, %v196_v51 }
   0xd   : > { %s747_s16 = smov (!%p163_p3, %s572_s16), 7  ;;  %s749_s13 = smov (!%p168_p4, %s691_s13), 1 }
   0xe   : > { %s573_s19 = sshll.u32 %s747_s16, 3  ;;  %s588_s27 = sshll.u32 %s749_s13, 4 }
   0xf   : > { %s166_s22 = scalar_lea.vmem %s742_s0, %s573_s19  ;;  %s172_s30 = scalar_lea.vmem %s745_s3, %s588_s27 }
  0x10   : > { %v174_v3 = vld [vmem:[%s166_s22] sm:$0xff]  ;;  %v175_v4 = vld [vmem:[%s166_s22 + $0x8] sm:$0xff]  ;;  %v176_v6 = vld [vmem:[%s166_s22 + $0x10] sm:$0xff] }
  0x11   : > { %v178_v5 = vpack.c.bf16 %v175_v4, %v174_v3  ;;  %v177_v7 = vld [vmem:[%s166_s22 + $0x18] sm:$0xff] }
  0x12   : > { %v179_v8 = vpack.c.bf16 %v177_v7, %v176_v6 }
  0x13   : > { %579 = vmatmul.mubr.msk.bf16.vlgmr.msra.gmra.mrb[0].mxu0 %vm217_vm0, %v178_v5  ;;  %601 = vmatprep.mubr.msk.bf16.mxu1 %vm217_vm0, %v178_v5 }
  0x14   : > { %266 = vmatprep.mubr.bf16.mxu0 %v662_v2  ;;  %602 = vmatmul.mubr.msk.bf16.vlgmr.msra.gmra.mrb[0].mxu1 %vm217_vm0, %v179_v8 }
  0x1b   : > { %580 = vmatmul.mubr.msk.bf16.gmra.mrb[4].mxu0 %vm217_vm0, %v179_v8 }
  0xe6   : > { %v258_v15 = vpop.f32.mrb[0].mxu0 }
  0xe7   : > { %v260_v17 = vpop.f32.mrb[1].mxu0  ;;  %v259_v19 = vadd.f32 %v258_v15, %v189_v14  ;;  %v603_v53 = vpop.f32.mrb[0].mxu1 }
  0xe8   : > { %v262_v18 = vpop.f32.mrb[2].mxu0  ;;  %v261_v22 = vadd.f32 %v260_v17, %v193_v16  ;;  %v320_v54 = vadd.f32 %v603_v53, %v197_v52  ;;  %v311_v55 = vpop.f32.mrb[1].mxu1 }
  0xe9   : > { %v263_v20 = vadd.f32 %v262_v18, %v189_v14  ;;  %v264_v21 = vpop.f32.mrb[3].mxu0  ;;  %v312_v56 = vadd.f32 %v311_v55, %v197_v52  ;;  %v604_v57 = vpop.f32.mrb[2].mxu1 }
  0xea   : > { %v265_v23 = vadd.f32 %v264_v21, %v193_v16  ;;  %v323_v58 = vadd.f32 %v604_v57, %v197_v52  ;;  %v314_v59 = vpop.f32.mrb[3].mxu1 }
  0xeb   : > { %v326_v24 = vpack.c.bf16 %v263_v20, %v259_v19  ;;  %v315_v60 = vadd.f32 %v314_v59, %v197_v52  ;;  %v663_v19 = vmov 0.0  }
  0xec   : > { %v328_v25 = vpack.c.bf16 %v265_v23, %v261_v22  ;;  %v331_v61 = vpack.c.bf16 %v323_v58, %v320_v54  ;;  %613 = vmatprep.subr.bf16.mxu1 %v663_v19  ;;  %617 = vmatprep.mubr.msk.bf16.mxu1 %vm664_vm2, %v663_v19 }
  0xed   : > { %609 = vmatprep.mubr.msk.bf16.mxu0 %vm217_vm0, %v326_v24  ;;  %v330_v62 = vpack.c.bf16 %v315_v60, %v312_v56 }
  0xee   : > { %v268_v26 = vpop.f32.mrb[4].mxu0  ;;  %621 = vmatprep.subr.msk.bf16.mxu0 %vm217_vm0, %v328_v25  ;;  %v339_v27 = vsel %vm217_vm0, %v328_v25, 0 }
  0xef   : > { %v270_v28 = vpop.f32.mrb[5].mxu0  ;;  %606 = vmatpush3.bf16.xpose.msra.mxu0 %v339_v27  ;;  %v269_v30 = vadd.f32 %v268_v26, %v189_v14 }
  0xf0   : > { %v272_v29 = vpop.f32.mrb[6].mxu0  ;;  %v271_v33 = vadd.f32 %v270_v28, %v193_v16 }
  0xf1   : > { %v273_v31 = vadd.f32 %v272_v29, %v189_v14  ;;  %v274_v32 = vpop.f32.mrb[7].mxu0 }
  0xf2   : > { %v275_v34 = vadd.f32 %v274_v32, %v193_v16 }
  0xf3   : > { %v327_v35 = vpack.c.bf16 %v273_v31, %v269_v30 }
  0xf4   : > { %v329_v36 = vpack.c.bf16 %v275_v34, %v271_v33 }
  0xf6   : > { %622 = vmatprep.subr.msk.bf16.mxu0 %vm217_vm0, %v329_v36  ;;  %v342_v37 = vsel %vm217_vm0, %v329_v36, 0 }
  0xf7   : > { %608 = vmatpush3.bf16.xpose.msra.mxu0 %v342_v37 }
  0xfe   : > { %610 = vmatmul.mubr.msk.bf16.vlgmr.msra.gmra.mrb[8].mxu0 %vm217_vm0, %v327_v35 }
 0x1d1   : > { %v611_v39 = vpop.f32.mrb[8].mxu0 }
 0x1d2   : > { %v395_v40 = vmul.f32 0.25, %v611_v39  ;;  %v378_v41 = vpop.f32.mrb[9].mxu0 }
 0x1d3   : > { %v393_v42 = vmul.f32 0.25, %v378_v41  ;;  %v612_v43 = vpop.f32.mrb[10].mxu0 }
 0x1d4   : > { %v396_v44 = vmul.f32 0.25, %v612_v43  ;;  %v381_v45 = vpop.f32.mrb[11].mxu0  ;;  %v404_v46 = vsel %vm397_vm1, %v395_v40, -inf }
 0x1d5   : > { %v394_v47 = vmul.f32 0.25, %v381_v45  ;;  %405 = vmax.xlane.f32.xlu1 %v404_v46  ;;  %v398_v48 = vsel %vm397_vm1, %v393_v42, -inf }
 0x1d6   : > { %399 = vmax.xlane.f32.xlu0 %v398_v48  ;;  %v407_v49 = vsel %vm397_vm1, %v396_v44, -inf }
 0x1d7   : > { %v401_v50 = vsel %vm397_vm1, %v394_v47, -inf }
 0x1d9   : > { %408 = vmax.xlane.f32.xlu1 %v407_v49 }
 0x1da   : > { %402 = vmax.xlane.f32.xlu0 %v401_v50 }
 0x262   : > { %v406_v63 = vpop.xlane.xlu1 %405 }
 0x263   : > { %v412_v0 = vsub.f32 %v395_v40, %v406_v63  ;;  %v400_v1 = vpop.xlane.xlu0 %399 }
 0x264   : > { %v410_v2 = vsub.f32 %v393_v42, %v400_v1 }
 0x265   : > { %v418_v3 = vmul.f32 1.442695, %v412_v0 }
 0x266   : > { %v414_v4 = vmul.f32 1.442695, %v410_v2  ;;  %v409_v5 = vpop.xlane.xlu1 %408 }
 0x267   : > { %v413_v6 = vsub.f32 %v396_v44, %v409_v5  ;;  %v403_v7 = vpop.xlane.xlu0 %402 }
 0x268   : > { %638 = vpow2.f32 %v414_v4  ;;  %v411_v8 = vsub.f32 %v394_v47, %v403_v7 }
 0x269   : > { %640 = vpow2.f32 %v418_v3  ;;  %v420_v9 = vmul.f32 1.442695, %v413_v6 }
 0x26a   : > { %v416_v10 = vmul.f32 1.442695, %v411_v8 }
 0x26c   : > { %642 = vpow2.f32 %v416_v10 }
 0x26d   : > { %644 = vpow2.f32 %v420_v9 }
 0x272   : > { %v639_v11 = vpop.eup %638 }
 0x273   : > { %v422_v12 = vsel %vm397_vm1, %v639_v11, 0.0  ;;  %v641_v13 = vpop.eup %640 }
 0x274   : > { %423 = vadd.xlane.f32.xlu0 %v422_v12  ;;  %v428_v15 = vsel %vm397_vm1, %v641_v13, 0.0 }
 0x276   : > { %v643_v14 = vpop.eup %642 }
 0x277   : > { %v425_v16 = vsel %vm397_vm1, %v643_v14, 0.0  ;;  %v645_v17 = vpop.eup %644 }
 0x278   : > { %429 = vadd.xlane.f32.xlu0 %v428_v15  ;;  %426 = vadd.xlane.f32.xlu1 %v425_v16  ;;  %v431_v18 = vsel %vm397_vm1, %v645_v17, 0.0 }
 0x27c   : > { %432 = vadd.xlane.f32.xlu1 %v431_v18 }
 0x2a5   : > { %444 = vxpose.xlu0.c.b16.start [1/2] (short) (narrow) %v330_v62, 16 }
 0x2a9   : > { %445 = vxpose.xlu0.c.b16.end [2/2] (short) (narrow) %v331_v61, 16 }
 0x301   : > { %v424_v20 = vpop.xlane.xlu0 %423 }
 0x302   : > { %646 = vrcp.f32 %v424_v20 }
 0x305   : > { %v427_v21 = vpop.xlane.xlu1 %426  ;;  %v430_v22 = vpop.xlane.xlu0 %429 }
 0x306   : > { %648 = vrcp.f32 %v427_v21 }
 0x307   : > { %650 = vrcp.f32 %v430_v22 }
 0x309   : > { %v433_v23 = vpop.xlane.xlu1 %432 }
 0x30a   : > { %652 = vrcp.f32 %v433_v23 }
 0x30b   : > { %v452_v36 = vpop.trf.xlu0 }
 0x30c   : > { %v647_v24 = vpop.eup %646 }
 0x30d   : > { %v438_v26 = vmul.f32 %v647_v24, %v639_v11 }
 0x310   : > { %v649_v25 = vpop.eup %648 }
 0x311   : > { %v439_v27 = vmul.f32 %v649_v25, %v643_v14  ;;  %v651_v28 = vpop.eup %650 }
 0x312   : > { %v440_v33 = vmul.f32 %v651_v28, %v641_v13 }
 0x313   : > { %v442_v29 = vpack.c.bf16 %v439_v27, %v438_v26 }
 0x314   : > { %v653_v30 = vpop.eup %652 }
 0x315   : > { %v464_v31 = vsel %vm397_vm1, %v442_v29, 0  ;;  %v441_v32 = vmul.f32 %v653_v30, %v645_v17 }
 0x316   : > { %614 = vmatpush3.bf16.xpose.msra.mxu1 %v464_v31 }
 0x317   : > { %615 = vmatprep.subr.bf16.mxu1 %v663_v19  ;;  %v443_v34 = vpack.c.bf16 %v441_v32, %v440_v33 }
 0x319   : > { %v467_v35 = vsel %vm397_vm1, %v443_v34, 0 }
 0x31e   : > { %616 = vmatpush3.bf16.xpose.msra.mxu1 %v467_v35 }
 0x325   : > { %618 = vmatmul.mubr.msk.bf16.vlgmr.msra.gmra.mrb[4].mxu1 %vm397_vm1, %v452_v36 }
 0x3f8   : > { %v503_v37 = vpop.f32.mrb[4].mxu1 }
 0x3f9   : > { %510 = vst.msk [vmem:[%s172_s30] sm:$0xff] %vm397_vm1, %v503_v37  ;;  %v619_v38 = vpop.f32.mrb[5].mxu1 }
 0x3fa   : > { %v506_v39 = vpop.f32.mrb[6].mxu1 }
 0x3fb   : > { %511 = vst.msk [vmem:[%s172_s30 + $0x8] sm:$0xff] %vm397_vm1, %v506_v39  ;;  %v620_v40 = vpop.f32.mrb[7].mxu1 }
 0x3fc PF: > { %s13_s12 = sadd.s32 1, %s660_s12  }
 0x3fd   : > { %p10_p5 = scmp.ge.s32.totalorder %s13_s12, 4  }
 0x3ff   :  { %12 = sbr.rel (!%p10_p5) target bundleno = 1 (0x1), region = 62 }

// kernel: maniqa_forward.9
= control target key start
LH: loop header
LB: loop body
LE: loop exit
PB: predicated region body
PF: predicated region fallthrough
CT: control target
= control target key end

     0   :  { %s568_s12 = smov 0   ;;  %s614_s0 = inlined_call_operand.vmem [shape: f32[16,16], index: 0, kind: input, shape index: {}]   ;;  %s615_s1 = inlined_call_operand.vmem [shape: bf16[16,384], index: 1, kind: input, shape index: {}]   ;;  %s616_s2 = inlined_call_operand.vmem [shape: f32[1,384], index: 2, kind: input, shape index: {}]   ;;  %s617_s3 = inlined_call_operand.vmem [shape: f32[2,16,8], index: 3, kind: output, shape index: {}]  }
   0x1 LB: > { %s476_s13 = sadd.s32 4294967295, %s543_s12   ;;  %p480_p0 = scmp.ge.s32.totalorder %s543_s12, 1  ;;  %s543_s12 = sphi %s568_s12, %s13_s12  }
   0x2   : > { %p136_p1 = scmp.lt.s32.totalorder %s543_s12, 3 }
   0x4   : > { %p137_p2 = pnand %p480_p0, %p136_p1 }
   0x5   : > { %v529_v0 = vld [vmem:[%s615_s1 + $0x4] ss:$12 sps:$4 sm:$0xff] (!%p137_p2)   ;;  %p159_p3 = scmp.lt.s32.totalorder (!%p137_p2), %s476_s13, 1  ;;  %v531_v1 = vld [vmem:[%s615_s1] ss:$12 sps:$4 sm:$0xff] (!%p137_p2)   ;;  %v545_v2 = vmov (!%p137_p2), 0   ;;  %v177_v6 = vlaneseq (!%p137_p2) }
   0x6   : > { %140 = sbr.rel (%p137_p2) target bundleno = 997 (0x3e5), region = 32  ;;  %244 = vmatprep.mubr.bf16.mxu0 (!%p137_p2), %v545_v2  ;;  %212 = vmatprep.subr.bf16.mxu0 (!%p137_p2), %v529_v0  ;;  %vm208_vm0 = vcmask (!%p137_p2), 130048   ;;  %v546_v5 = vmov (!%p137_p2), 0.0   ;;  %vm547_vm1 = vmmov (!%p137_p2), 0   ;;  %v175_v9 = vld [vmem:[%s616_s2] sm:$0x7] (!%p137_p2) }
   0x7   : > { %213 = vmatpush1.bf16.msra.mxu0 (!%p137_p2), %v531_v1  ;;  %500 = vmatprep.subr.bf16.mxu1 (!%p137_p2), %v546_v5  ;;  %v178_v7 = vshrl.u32 (!%p137_p2), %v177_v6, 7  ;;  %v532_v22 = vld [vmem:[%s615_s1 + $0x8] ss:$12 sps:$4 sm:$0xff] (!%p137_p2)   ;;  %vm343_vm2 = vcmask (!%p137_p2), 64512  }
   0x8   : > { %506 = vmatprep.subr.bf16.mxu0 (!%p137_p2), %v546_v5  ;;  %502 = vmatprep.mubr.msk.bf16.mxu1 (!%p137_p2), %vm547_vm1, %v546_v5 }
   0x9   : > { %v183_v8 = vsub.s32 (!%p137_p2), 1, %v178_v7  ;;  %v179_v11 = vsub.s32 (!%p137_p2), 0, %v178_v7  ;;  %501 = vmatpush3.bf16.msra.mxu1 (!%p137_p2), %v532_v22  ;;  %v187_v29 = vsub.s32 (!%p137_p2), 2, %v178_v7 }
   0xa   : > { %512 = vmatprep.subr.bf16.mxu1 (!%p137_p2), %v546_v5 }
   0xb   : > { %v184_v10 = vrot.slane (!%p137_p2), %v175_v9, %v183_v8  ;;  %v180_v17 = vrot.slane (!%p137_p2), %v175_v9, %v179_v11  ;;  %v188_v30 = vrot.slane (!%p137_p2), %v175_v9, %v187_v29 }
   0xd   : > { %s619_s13 = smov (!%p159_p3, %s476_s13), 1 }
   0xe   : > { %s481_s18 = sshll.u32 %s619_s13, 3  ;;  %s493_s26 = sshll.u32 %s619_s13, 4 }
   0xf   : > { %s162_s21 = scalar_lea.vmem %s614_s0, %s481_s18  ;;  %s167_s29 = scalar_lea.vmem %s617_s3, %s493_s26 }
  0x10   : > { %v169_v3 = vld [vmem:[%s162_s21] sm:$0xff] }
  0x11   : > { %v170_v4 = vpack.c.bf16 %v169_v3, %v169_v3 }
  0x13   : > { %487 = vmatmul.mubr.msk.bf16.vlgmr.msra.gmra.mrb[0].mxu0 %vm208_vm0, %v170_v4  ;;  %503 = vmatmul.mubr.msk.bf16.vlgmr.msra.gmra.mrb[0].mxu1 %vm208_vm0, %v170_v4 }
  0x14   : > { %508 = vmatprep.mubr.msk.bf16.mxu0 %vm547_vm1, %v546_v5  ;;  %514 = vmatprep.mubr.msk.bf16.mxu1 %vm547_vm1, %v546_v5 }
  0xe6   : > { %v246_v12 = vpop.f32.mrb[0].mxu0  ;;  %v287_v31 = vpop.f32.mrb[0].mxu1 }
  0xe7   : > { %v248_v13 = vpop.f32.mrb[1].mxu0  ;;  %v247_v20 = vadd.f32 %v246_v12, %v180_v17  ;;  %v504_v32 = vpop.f32.mrb[1].mxu1  ;;  %v288_v33 = vadd.f32 %v287_v31, %v188_v30 }
  0xe8   : > { %v249_v14 = vadd.f32 %v248_v13, %v184_v10  ;;  %v250_v15 = vpop.f32.mrb[2].mxu0  ;;  %v290_v34 = vpop.f32.mrb[2].mxu1 }
  0xe9   : > { %v251_v16 = vpop.f32.mrb[3].mxu0  ;;  %v293_v21 = vpack.c.bf16 %v247_v20, %v247_v20  ;;  %v505_v35 = vpop.f32.mrb[3].mxu1  ;;  %v295_v36 = vpack.c.bf16 %v288_v33, %v288_v33 }
  0xea   : > { %v294_v18 = vpack.c.bf16 %v249_v14, %v249_v14 }
  0xeb   : > { %356 = vxpose.xlu1.c.b16.start.end [1/1] (short) (narrow) %v295_v36, 16 }
  0xec   : > { %v300_v19 = vsel %vm208_vm0, %v294_v18, 0 }
  0xed   : > { %507 = vmatpush3.bf16.xpose.msra.mxu0 %v300_v19 }
  0xf4   : > { %509 = vmatmul.mubr.msk.bf16.vlgmr.msra.gmra.mrb[4].mxu0 %vm208_vm0, %v293_v21 }
 0x151   : > { %v364_v47 = vpop.trf.xlu1 }
 0x1c7   : > { %v336_v23 = vpop.f32.mrb[4].mxu0 }
 0x1c8   : > { %v342_v24 = vmul.f32 0.25, %v336_v23  ;;  %v510_v25 = vpop.f32.mrb[5].mxu0 }
 0x1c9   : > { %v339_v26 = vpop.f32.mrb[6].mxu0 }
 0x1ca   : > { %v511_v27 = vpop.f32.mrb[7].mxu0  ;;  %v344_v28 = vsel %vm343_vm2, %v342_v24, -inf }
 0x1cb   : > { %345 = vmax.xlane.f32.xlu0 %v344_v28 }
 0x258   : > { %v346_v37 = vpop.xlane.xlu0 %345 }
 0x259   : > { %v347_v38 = vsub.f32 %v342_v24, %v346_v37 }
 0x25b   : > { %v348_v39 = vmul.f32 1.442695, %v347_v38 }
 0x25d   : > { %533 = vpow2.f32 %v348_v39 }
 0x267   : > { %v534_v40 = vpop.eup %533 }
 0x268   : > { %v350_v41 = vsel %vm343_vm2, %v534_v40, 0.0 }
 0x269   : > { %351 = vadd.xlane.f32.xlu0 %v350_v41 }
 0x2f6   : > { %v352_v42 = vpop.xlane.xlu0 %351 }
 0x2f7   : > { %535 = vrcp.f32 %v352_v42 }
 0x301   : > { %v536_v43 = vpop.eup %535 }
 0x302   : > { %v354_v44 = vmul.f32 %v536_v43, %v534_v40 }
 0x304   : > { %v355_v45 = vpack.c.bf16 %v354_v44, %v354_v44 }
 0x306   : > { %v376_v46 = vsel %vm343_vm2, %v355_v45, 0 }
 0x307   : > { %513 = vmatpush3.bf16.xpose.msra.mxu1 %v376_v46 }
 0x30e   : > { %515 = vmatmul.mubr.msk.bf16.vlgmr.msra.gmra.mrb[4].mxu1 %vm343_vm2, %v364_v47 }
 0x3e1   : > { %v412_v48 = vpop.f32.mrb[4].mxu1 }
 0x3e2   : > { %419 = vst.msk [vmem:[%s167_s29] sm:$0xff] %vm343_vm2, %v412_v48  ;;  %v516_v49 = vpop.f32.mrb[5].mxu1 }
 0x3e3   : > { %v415_v50 = vpop.f32.mrb[6].mxu1 }
 0x3e4   : > { %420 = vst.msk [vmem:[%s167_s29 + $0x8] sm:$0xff] %vm343_vm2, %v415_v50  ;;  %v517_v51 = vpop.f32.mrb[7].mxu1 }
 0x3e5 PF: > { %s13_s12 = sadd.s32 1, %s543_s12  }
 0x3e6   : > { %p10_p4 = scmp.ge.s32.totalorder %s13_s12, 4  }
 0x3e8   :  { %12 = sbr.rel (!%p10_p4) target bundleno = 1 (0x1), region = 62 }

// kernel: maniqa_forward.11
= control target key start
LH: loop header
LB: loop body
LE: loop exit
PB: predicated region body
PF: predicated region fallthrough
CT: control target
= control target key end

     0   :  { %v489_v0 = vmov 0.0   ;;  %vm40_vm0 = vcmask 1043456   ;;  %vm490_vm1 = vmmov 0   ;;  %v491_v3 = vmov 0   ;;  %s613_s0 = inlined_call_operand.vmem [shape: f32[2,8,16], index: 0, kind: input, shape index: {}]   ;;  %s614_s2 = inlined_call_operand.vmem [shape: f32[4,1], index: 2, kind: input, shape index: {}]   ;;  %s615_s4 = inlined_call_operand.vmem [shape: f32[8,1], index: 4, kind: input, shape index: {}]   ;;  %s616_s1 = inlined_call_operand.vmem [shape: bf16[4,8], index: 1, kind: input, shape index: {}]   ;;  %s617_s6 = inlined_call_operand.vmem [shape: f32[2,1], index: 6, kind: input, shape index: {}]   ;;  %s618_s3 = inlined_call_operand.vmem [shape: bf16[8,4], index: 3, kind: input, shape index: {}]   ;;  %s619_s5 = inlined_call_operand.vmem [shape: bf16[2,8], index: 5, kind: input, shape index: {}]   ;;  %s620_s7 = inlined_call_operand.vmem [shape: f32[2,1,1], index: 7, kind: output, shape index: {}]  }
   0x1   :  { %436 = vmatprep.subr.bf16.mxu0 %v489_v0  ;;  %v27_v1 = vld [vmem:[%s613_s0] sm:$0xff]  ;;  %438 = vmatprep.mubr.msk.bf16.mxu0 %vm490_vm1, %v489_v0  ;;  %vm36_vm2 = vcmask 64512   ;;  %v418_v11 = vld [vmem:[%s613_s0 + $0x8] sm:$0xff]  ;;  %vm96_vm3 = vcmask 1041408   ;;  %vm92_vm4 = vcmask 31744   ;;  %vm210_vm5 = vcmask 123905  }
   0x2   :  { %v28_v2 = vpack.c.bf16 %v27_v1, %v27_v1  ;;  %475 = vset.pattern.permute.xlu0 %v491_v3  ;;  %v30_v4 = vld [vmem:[%s614_s2] sm:$0xf]  ;;  %442 = vmatprep.subr.bf16.mxu1 %v489_v0  ;;  %v223_v17 = vpack.c.bf16 %v418_v11, %v418_v11  ;;  %vm206_vm6 = vcmask 122880   ;;  %vm219_vm7 = vcmask 0  }
   0x3   :  { %33 = vperm.xlu0 %475, %v30_v4   ;;  %444 = vmatprep.mubr.msk.bf16.mxu1 %vm490_vm1, %v489_v0  ;;  %v86_v6 = vld [vmem:[%s615_s4] sm:$0xff] }
   0x4   :  { %v42_v5 = vsel %vm40_vm0, %v28_v2, 0  ;;  %476 = vset.pattern.permute.xlu1 %v491_v3  ;;  %v29_v7 = vld [vmem:[%s616_s1] sm:$0x3]  ;;  %v235_v22 = vsel %vm40_vm0, %v223_v17, 0 }
   0x5   :  { %437 = vmatpush3.bf16.msra.mxu0 %v42_v5  ;;  %v143_v8 = vld [vmem:[%s617_s6] sm:$0x3] }
   0x6   :  { %448 = vmatprep.subr.bf16.mxu0 %v489_v0  ;;  %v225_v9 = vld [vmem:[%s614_s2] sm:$0xf] }
   0x7   :  { %89 = vperm.xlu0 %475, %v86_v6   ;;  %228 = vperm.xlu1 %476, %v225_v9   ;;  %v334_v10 = vld [vmem:[%s617_s6] sm:$0x3] }
   0x8   :  { %439 = vmatmul.mubr.msk.bf16.vlgmr.msra.gmra.mrb[0].mxu0 %vm36_vm2, %v29_v7  ;;  %v84_v21 = vld [vmem:[%s618_s3] sm:$0xf] }
   0x9   :  { %450 = vmatprep.mubr.msk.bf16.mxu0 %vm490_vm1, %v489_v0  ;;  %v224_v23 = vld [vmem:[%s616_s1] sm:$0x3] }
   0xa   :  { %v141_v35 = vld [vmem:[%s619_s5] sm:$0x1] }
   0xb   :  { %146 = vperm.xlu0 %475, %v143_v8   ;;  %282 = vperm.xlu1 %476, %v86_v6   ;;  %v277_v42 = vld [vmem:[%s618_s3] sm:$0xf] }
   0xc   :  { %v332_v61 = vld [vmem:[%s619_s5] sm:$0x1] }
   0xf   :  { %337 = vperm.xlu1 %476, %v334_v10  }
  0x82   :  { %v34_v12 = vpop.permute.xlu0 %33 }
  0x86   :  { %v90_v24 = vpop.permute.xlu0 %89  ;;  %v229_v33 = vpop.permute.xlu1 %228 }
  0x8a   :  { %v147_v43 = vpop.permute.xlu0 %146  ;;  %v283_v50 = vpop.permute.xlu1 %282 }
  0x8e   :  { %v338_v9 = vpop.permute.xlu1 %337 }
  0xdb   :  { %v78_v13 = vpop.f32.mrb[0].mxu0 }
  0xdc   :  { %v79_v14 = vadd.f32 %v78_v13, %v34_v12  ;;  %v440_v15 = vpop.f32.mrb[1].mxu0 }
  0xdd   :  { %v81_v16 = vpop.f32.mrb[2].mxu0 }
  0xde   :  { %v85_v18 = vpack.c.bf16 %v79_v14, %v79_v14  ;;  %v441_v19 = vpop.f32.mrb[3].mxu0 }
  0xe0   :  { %v98_v20 = vsel %vm96_vm3, %v85_v18, 0 }
  0xe1   :  { %443 = vmatpush3.bf16.msra.mxu1 %v98_v20 }
  0xe2   :  { %454 = vmatprep.subr.bf16.mxu1 %v489_v0 }
  0xe4   :  { %445 = vmatmul.mubr.msk.bf16.vlgmr.msra.gmra.mrb[0].mxu1 %vm92_vm4, %v84_v21 }
  0xe5   :  { %455 = vmatpush3.bf16.msra.mxu1 %v235_v22  ;;  %456 = vmatprep.mubr.msk.bf16.mxu1 %vm490_vm1, %v489_v0 }
  0xe6   :  { %466 = vmatprep.subr.bf16.mxu1 %v489_v0 }
  0xec   :  { %457 = vmatmul.mubr.msk.bf16.vlgmr.msra.gmra.mrb[4].mxu1 %vm36_vm2, %v224_v23 }
  0xed   :  { %468 = vmatprep.mubr.msk.bf16.mxu1 %vm490_vm1, %v489_v0 }
 0x1b7   :  { %v134_v25 = vpop.f32.mrb[0].mxu1 }
 0x1b8   :  { %v135_v26 = vadd.f32 %v134_v25, %v90_v24  ;;  %v446_v27 = vpop.f32.mrb[1].mxu1 }
 0x1b9   :  { %v137_v28 = vpop.f32.mrb[2].mxu1 }
 0x1ba   :  { %v140_v29 = vmax.f32 %v135_v26, 0.0  ;;  %v447_v30 = vpop.f32.mrb[3].mxu1 }
 0x1bc   :  { %v142_v31 = vpack.c.bf16 %v140_v29, %v140_v29 }
 0x1be   :  { %v153_v32 = vsel %vm40_vm0, %v142_v31, 0 }
 0x1bf   :  { %449 = vmatpush3.bf16.msra.mxu0 %v153_v32  ;;  %v271_v34 = vpop.f32.mrb[4].mxu1 }
 0x1c0   :  { %v272_v36 = vadd.f32 %v271_v34, %v229_v33  ;;  %v458_v37 = vpop.f32.mrb[5].mxu1  ;;  %460 = vmatprep.subr.bf16.mxu0 %v489_v0 }
 0x1c1   :  { %v274_v38 = vpop.f32.mrb[6].mxu1 }
 0x1c2   :  { %v278_v39 = vpack.c.bf16 %v272_v36, %v272_v36  ;;  %451 = vmatmul.mubr.msk.bf16.vlgmr.msra.gmra.mrb[4].mxu0 %vm36_vm2, %v141_v35  ;;  %v459_v40 = vpop.f32.mrb[7].mxu1 }
 0x1c3   :  { %462 = vmatprep.mubr.msk.bf16.mxu0 %vm490_vm1, %v489_v0 }
 0x1c4   :  { %v289_v41 = vsel %vm96_vm3, %v278_v39, 0 }
 0x1c5   :  { %461 = vmatpush3.bf16.msra.mxu0 %v289_v41 }
 0x1ca   :  { %463 = vmatmul.mubr.msk.bf16.vlgmr.msra.gmra.mrb[8].mxu0 %vm92_vm4, %v277_v42 }
 0x295   :  { %v189_v44 = vpop.f32.mrb[4].mxu0 }
 0x296   :  { %v190_v45 = vadd.f32 %v189_v44, %v147_v43  ;;  %v452_v46 = vpop.f32.mrb[5].mxu0 }
 0x297   :  { %v192_v47 = vpop.f32.mrb[6].mxu0 }
 0x298   :  { %v417_v48 = vmul.f32 -1.442695, %v190_v45  ;;  %v453_v49 = vpop.f32.mrb[7].mxu0  ;;  %v195_v63 = vmax.f32 %v190_v45, 0.0 }
 0x29a   :  { %477 = vpow2.f32 %v417_v48 }
 0x29d   :  { %v325_v51 = vpop.f32.mrb[8].mxu0 }
 0x29e   :  { %v326_v52 = vadd.f32 %v325_v51, %v283_v50  ;;  %v464_v53 = vpop.f32.mrb[9].mxu0 }
 0x29f   :  { %v328_v54 = vpop.f32.mrb[10].mxu0 }
 0x2a0   :  { %v331_v55 = vmax.f32 %v326_v52, 0.0  ;;  %v465_v56 = vpop.f32.mrb[11].mxu0 }
 0x2a2   :  { %v333_v57 = vpack.c.bf16 %v331_v55, %v331_v55 }
 0x2a4   :  { %v478_v58 = vpop.eup %477  ;;  %v344_v59 = vsel %vm40_vm0, %v333_v57, 0 }
 0x2a5   :  { %v199_v60 = vadd.f32 1.0, %v478_v58  ;;  %467 = vmatpush3.bf16.msra.mxu1 %v344_v59 }
 0x2a7   :  { %479 = vrcp.f32 %v199_v60 }
 0x2a8   :  { %469 = vmatmul.mubr.msk.bf16.vlgmr.msra.gmra.mrb[8].mxu1 %vm36_vm2, %v332_v61 }
 0x2b1   :  { %v480_v62 = vpop.eup %479 }
 0x2b2   :  { %v211_v0 = vsel %vm210_vm5, %v480_v62, 0.0  ;;  %v203_v1 = vrot.slane %v480_v62, 1 }
 0x2b3   :  { %212 = vadd.xlane.f32.xlu0 %v211_v0 }
 0x2b4   :  { %v205_v2 = vmul.f32 %v203_v1, %v195_v63 }
 0x2b6   :  { %v207_v3 = vsel %vm206_vm6, %v205_v2, 0.0 }
 0x2b7   :  { %208 = vadd.xlane.f32.xlu0 %v207_v3 }
 0x340   :  { %v213_v4 = vpop.xlane.xlu0 %212 }
 0x341   :  { %v215_v5 = vrot.slane %v213_v4, 1 }
 0x343   :  { %481 = vrcp.f32 %v215_v5 }
 0x344   :  { %v209_v7 = vpop.xlane.xlu0 %208 }
 0x34d   :  { %v482_v6 = vpop.eup %481 }
 0x34e   :  { %v218_v8 = vmul.f32 %v482_v6, %v209_v7 }
 0x350   :  { %220 = vst.msk [vmem:[%s620_s7] sm:$0x1] %vm219_vm7, %v218_v8 }
 0x37b   :  { %v380_v10 = vpop.f32.mrb[8].mxu1 }
 0x37c   :  { %v381_v11 = vadd.f32 %v380_v10, %v338_v9  ;;  %v470_v12 = vpop.f32.mrb[9].mxu1 }
 0x37d   :  { %v383_v13 = vpop.f32.mrb[10].mxu1 }
 0x37e   :  { %v422_v14 = vmul.f32 -1.442695, %v381_v11  ;;  %v471_v15 = vpop.f32.mrb[11].mxu1  ;;  %v386_v19 = vmax.f32 %v381_v11, 0.0 }
 0x380   :  { %483 = vpow2.f32 %v422_v14 }
 0x38a   :  { %v484_v16 = vpop.eup %483 }
 0x38b   :  { %v390_v17 = vadd.f32 1.0, %v484_v16 }
 0x38d   :  { %485 = vrcp.f32 %v390_v17 }
 0x397   :  { %v486_v18 = vpop.eup %485 }
 0x398   :  { %v400_v20 = vsel %vm210_vm5, %v486_v18, 0.0  ;;  %v394_v21 = vrot.slane %v486_v18, 1 }
 0x399   :  { %401 = vadd.xlane.f32.xlu1 %v400_v20 }
 0x39a   :  { %v396_v22 = vmul.f32 %v394_v21, %v386_v19 }
 0x39c   :  { %v397_v23 = vsel %vm206_vm6, %v396_v22, 0.0 }
 0x39d   :  { %398 = vadd.xlane.f32.xlu0 %v397_v23 }
 0x426   :  { %v402_v24 = vpop.xlane.xlu1 %401 }
 0x427   :  { %v404_v25 = vrot.slane %v402_v24, 1 }
 0x429   :  { %487 = vrcp.f32 %v404_v25 }
 0x42a   :  { %v399_v27 = vpop.xlane.xlu0 %398 }
 0x433   :  { %v488_v26 = vpop.eup %487 }
 0x434   :  { %v407_v28 = vmul.f32 %v488_v26, %v399_v27 }
 0x436   :  { %423 = vst.msk [vmem:[%s620_s7 + $0x1] sm:$0x1] %vm219_vm7, %v407_v28 }

</bundles_post_ra>
